<compile_context>
chip_gen: v6e
topology: v6e:2x2x1
jax: 0.10.0
libtpu: 0.0.40
codegen_flags: <defaults>
</compile_context>

<pallas_src>
import numpy as np
import jax
import jax.numpy as jnp
from jax.experimental import pallas as pl
from jax.experimental.pallas import tpu as pltpu


# ----------------------------------------------------------------------------
# Host-side construction of the (exact) PIL interpolation matrices.
# ----------------------------------------------------------------------------
def pil_nearest_matrix(dst, src):
    """PIL NEAREST resize along one axis as a (dst, src) matrix."""
    scale = src / dst
    m = np.zeros((dst, src), dtype=np.float32)
    for i in range(dst):
        j = int((i + 0.5) * scale)
        j = min(max(j, 0), src - 1)
        m[i, j] = 1.0
    return m


def pil_bilinear_matrix(dst, src):
    """PIL BILINEAR resize along one axis as a (dst, src) matrix.

    Mirrors Pillow's precompute_coeffs with a triangle filter (support=1),
    including the edge renormalization.
    """
    scale = src / dst
    filterscale = max(scale, 1.0)
    support = 1.0 * filterscale
    inv_fs = 1.0 / filterscale
    m = np.zeros((dst, src), dtype=np.float32)
    for i in range(dst):
        center = (i + 0.5) * scale
        xmin = max(int(center - support + 0.5), 0)
        xmax = min(int(center + support + 0.5), src)
        ws = []
        for x in range(xmin, xmax):
            w = 1.0 - abs((x - center + 0.5) * inv_fs)
            ws.append(max(w, 0.0))
        tot = sum(ws)
        for x, w in zip(range(xmin, xmax), ws):
            m[i, x] = w / tot
    return m


def _pick_row_tile(out_h):
    """Largest friendly tile dividing out_h, preferring >= 2 row tiles.

    Keeping n_h >= 2 makes grid = (C, n_h) split evenly across v7x's two
    TensorCores (e.g. C=3, out_h=1024 -> TM=512 -> 6 steps -> 3/3 per core)
    while still cutting per-grid-step overhead vs small tiles.
    """
    candidates = (1024, 512, 256, 128, 64, 32, 16, 8)
    divisors = [t for t in candidates if t <= out_h and out_h % t == 0]
    for t in divisors:
        if out_h // t >= 2:
            return t
    return divisors[0] if divisors else out_h


# ----------------------------------------------------------------------------
# Pallas kernel: per (channel, row-tile)  out = (A_h_tile @ plane) @ A_w^T.
# bf16 inputs, f32 accumulation on the MXU, output cast to out_ref.dtype.
# ----------------------------------------------------------------------------
def _crop_resize_kernel(img_ref, ah_ref, awt_ref, out_ref):
    tmp = jnp.dot(ah_ref[...], img_ref[...],
                  preferred_element_type=jnp.float32)            # (TM, crop_w) f32
    out_ref[...] = jnp.dot(tmp.astype(jnp.bfloat16), awt_ref[...],
                           preferred_element_type=jnp.float32
                           ).astype(out_ref.dtype)               # (TM, out_w)


def center_crop_and_resize(img_hwc, crop_size=(16, 16), resize_size=(64, 64),
                           out_dtype=jnp.bfloat16):
    """Pallas equivalent of CenterCropAndResize.forward.

    Args:
      img_hwc: float32 array of shape (H, W, C)  (PIL-style: width is axis 1).
      crop_size: (crop_width, crop_height)
      resize_size: (out_width, out_height)
      out_dtype: output dtype (bf16 default; the kernel is writeback-bound so a
        narrow output is the dominant HBM-traffic lever).
    Returns:
      out: (C, out_h, out_w) array in out_dtype (CHW, as after permute(2,0,1)).
    """
    H, W, C = img_hwc.shape
    crop_w, crop_h = crop_size
    out_w, out_h = resize_size
    mid_w, mid_h = out_w // 2, out_h // 2
    left = (W - crop_w) // 2
    top = (H - crop_h) // 2

    # Separable linear maps on the *cropped* image: nearest(x2) then bilinear.
    a_h = pil_bilinear_matrix(out_h, mid_h) @ pil_nearest_matrix(mid_h, crop_h)  # (out_h, crop_h)
    a_w = pil_bilinear_matrix(out_w, mid_w) @ pil_nearest_matrix(mid_w, crop_w)  # (out_w, crop_w)

    ah = jnp.asarray(a_h, dtype=jnp.bfloat16)                    # (out_h, crop_h)
    awt = jnp.asarray(a_w.T, dtype=jnp.bfloat16)                 # (crop_w, out_w)

    # Crop BEFORE transposing so the strided HWC->CHW gather only touches the
    # crop window, then cast to bf16 for the MXU.
    img_crop = jnp.transpose(
        img_hwc[top:top + crop_h, left:left + crop_w, :], (2, 0, 1)
    ).astype(jnp.bfloat16)                                       # (C, crop_h, crop_w)

    tm = _pick_row_tile(out_h)
    n_h = out_h // tm

    out_itemsize = jnp.dtype(out_dtype).itemsize
    flops = 2 * C * (out_h * crop_h * crop_w + out_h * crop_w * out_w)
    # image re-fetched once per channel; ah tiles re-fetched once per channel
    # (grid iterates h fastest); awt fetched once; output written once.
    bytes_accessed = (2 * (C * crop_h * crop_w + C * out_h * crop_h + crop_w * out_w)
                      + out_itemsize * C * out_h * out_w)

    out = pl.pallas_call(
        _crop_resize_kernel,
        out_shape=jax.ShapeDtypeStruct((C, out_h, out_w), out_dtype),
        grid=(C, n_h),
        in_specs=[
            # Same block for every row-tile of a channel -> fetched once per channel.
            pl.BlockSpec((pl.Squeezed(), crop_h, crop_w), lambda c, h: (c, 0, 0)),
            pl.BlockSpec((tm, crop_h), lambda c, h: (h, 0)),
            pl.BlockSpec((crop_w, out_w), lambda c, h: (0, 0)),
        ],
        out_specs=pl.BlockSpec((pl.Squeezed(), tm, out_w), lambda c, h: (c, h, 0)),
        compiler_params=pltpu.CompilerParams(
            dimension_semantics=("parallel", "parallel")),
        cost_estimate=pl.CostEstimate(
            flops=flops, transcendentals=0, bytes_accessed=bytes_accessed),
    )(img_crop, ah, awt)
    return out


if __name__ == "__main__":
    # Small-shape analogue of the real module (512x256 -> crop 256x256 ->
    # nearest 512x512 -> bilinear 1024x1024), scaled down 16x:
    #   image width=32, height=16, crop (16,16), resize (64,64), C=3.
    key = jax.random.PRNGKey(0)
    H, W, C = 16, 32, 3
    img = jax.random.uniform(key, (H, W, C), dtype=jnp.float32) * 255.0

    crop_size = (16, 16)
    resize_size = (64, 64)
    out = center_crop_and_resize(img, crop_size=crop_size, resize_size=resize_size)
    out = jax.block_until_ready(out)
    assert out.shape == (C, 64, 64), out.shape
    assert out.dtype == jnp.bfloat16, out.dtype
    out_f32 = np.asarray(out, dtype=np.float32)

    # Rebuild the same linear maps / cropped image for the reference checks.
    crop_w, crop_h = crop_size
    out_w, out_h = resize_size
    mid_w, mid_h = out_w // 2, out_h // 2
    left = (W - crop_w) // 2
    top = (H - crop_h) // 2
    a_h = pil_bilinear_matrix(out_h, mid_h) @ pil_nearest_matrix(mid_h, crop_h)
    a_w = pil_bilinear_matrix(out_w, mid_w) @ pil_nearest_matrix(mid_w, crop_w)
    ah = jnp.asarray(a_h, dtype=jnp.bfloat16)
    awt = jnp.asarray(a_w.T, dtype=jnp.bfloat16)
    img_crop = jnp.transpose(
        img[top:top + crop_h, left:left + crop_w, :], (2, 0, 1)
    ).astype(jnp.bfloat16)

    # Reference 1: same mixed precision as the kernel (bf16 in, f32 acc,
    # bf16 re-cast of the row-resized intermediate, bf16 output cast).
    tmp = jnp.einsum("oh,chw->cow", ah, img_crop,
                     preferred_element_type=jnp.float32)
    ref_mixed = jnp.einsum("cow,wp->cop", tmp.astype(jnp.bfloat16), awt,
                           preferred_element_type=jnp.float32
                           ).astype(jnp.bfloat16)
    assert np.allclose(out_f32, np.asarray(ref_mixed, dtype=np.float32),
                       atol=2.0, rtol=2e-2)

    # Reference 2: full-f32 evaluation of the same linear maps (loose check,
    # bounds bf16 quantization error on 0..255 pixel data).
    ref_f32 = jnp.einsum("oh,chw,wp->cop",
                         ah.astype(jnp.float32),
                         img_crop.astype(jnp.float32),
                         awt.astype(jnp.float32))
    assert np.allclose(out_f32, np.asarray(ref_f32),
                       atol=4.0, rtol=4e-2)

    print("KERNEL_OK")
</pallas_src>

<mosaic_0001>
module attributes {stable_mosaic.version = 11 : i64} {
  func.func @_crop_resize_kernel(%arg0: i32, %arg1: i32, %arg2: memref<1x16x16xbf16, #tpu.memory_space<vmem>>, %arg3: memref<32x16xbf16, #tpu.memory_space<vmem>>, %arg4: memref<16x64xbf16, #tpu.memory_space<vmem>>, %arg5: memref<1x32x64xbf16, #tpu.memory_space<vmem>>) attributes {dimension_semantics = [#tpu.dimension_semantics<parallel>, #tpu.dimension_semantics<parallel>], iteration_bounds = array<i64: 3, 2>, scalar_prefetch = 0 : i64, scratch_operands = 0 : i64, tpu.core_type = #tpu.core_type<tc>, window_params = [{transform_indices = @transform_0, window_bounds = array<i64: 1, 16, 16>}, {transform_indices = @transform_1, window_bounds = array<i64: 32, 16>}, {pipeline_mode = #tpu.pipeline_mode<synchronous>, transform_indices = @transform_2, window_bounds = array<i64: 16, 64>}, {transform_indices = @transform_3, window_bounds = array<i64: 1, 32, 64>}]} {
    %c0 = arith.constant 0 : index
    %c0_0 = arith.constant 0 : index
    %0 = vector.load %arg3[%c0, %c0_0] : memref<32x16xbf16, #tpu.memory_space<vmem>>, vector<32x16xbf16>
    %c0_1 = arith.constant 0 : index
    %c0_2 = arith.constant 0 : index
    %c0_3 = arith.constant 0 : index
    %1 = vector.load %arg2[%c0_1, %c0_2, %c0_3] : memref<1x16x16xbf16, #tpu.memory_space<vmem>>, vector<1x16x16xbf16>
    %2 = vector.shape_cast %1 : vector<1x16x16xbf16> to vector<16x16xbf16>
    %cst = arith.constant dense<0.000000e+00> : vector<32x16xf32>
    %3 = tpu.matmul %0, %2, %cst {dimension_numbers = #tpu.dot_dimension_numbers<[1], [0], [0], [1], [0, 0, 1, 1], [], []>} : vector<32x16xbf16>, vector<16x16xbf16>, vector<32x16xf32> -> vector<32x16xf32>
    %4 = arith.truncf %3 : vector<32x16xf32> to vector<32x16xbf16>
    %c0_4 = arith.constant 0 : index
    %c0_5 = arith.constant 0 : index
    %5 = vector.load %arg4[%c0_4, %c0_5] : memref<16x64xbf16, #tpu.memory_space<vmem>>, vector<16x64xbf16>
    %cst_6 = arith.constant dense<0.000000e+00> : vector<32x64xf32>
    %6 = tpu.matmul %4, %5, %cst_6 {dimension_numbers = #tpu.dot_dimension_numbers<[1], [0], [0], [1], [0, 0, 1, 1], [], []>} : vector<32x16xbf16>, vector<16x64xbf16>, vector<32x64xf32> -> vector<32x64xf32>
    %7 = arith.truncf %6 : vector<32x64xf32> to vector<32x64xbf16>
    %c0_7 = arith.constant 0 : index
    %c0_8 = arith.constant 0 : index
    %c0_9 = arith.constant 0 : index
    %8 = vector.load %arg5[%c0_7, %c0_8, %c0_9] : memref<1x32x64xbf16, #tpu.memory_space<vmem>>, vector<1x32x64xbf16>
    %9 = vector.shape_cast %8 : vector<1x32x64xbf16> to vector<32x64xbf16>
    %10 = vector.shape_cast %7 : vector<32x64xbf16> to vector<1x32x64xbf16>
    tpu.vector_store %arg5[%c0_7, %c0_8, %c0_9], %10 {strides = array<i32>} : memref<1x32x64xbf16, #tpu.memory_space<vmem>>, vector<1x32x64xbf16>,
    return
  }
  func.func @transform_0(%arg0: i32, %arg1: i32) -> (i32, i32, i32) {
    %c0_i32 = arith.constant 0 : i32
    %c0_i32_0 = arith.constant 0 : i32
    %c0_i32_1 = arith.constant 0 : i32
    return %arg0, %c0_i32, %c0_i32_0 : i32, i32, i32
  }
  func.func @transform_1(%arg0: i32, %arg1: i32) -> (i32, i32) {
    %c0_i32 = arith.constant 0 : i32
    %c0_i32_0 = arith.constant 0 : i32
    return %arg1, %c0_i32 : i32, i32
  }
  func.func @transform_2(%arg0: i32, %arg1: i32) -> (i32, i32) {
    %c0_i32 = arith.constant 0 : i32
    %c0_i32_0 = arith.constant 0 : i32
    %c0_i32_1 = arith.constant 0 : i32
    return %c0_i32, %c0_i32_0 : i32, i32
  }
  func.func @transform_3(%arg0: i32, %arg1: i32) -> (i32, i32, i32) {
    %c0_i32 = arith.constant 0 : i32
    %c0_i32_0 = arith.constant 0 : i32
    return %arg0, %arg1, %c0_i32 : i32, i32, i32
  }
}

</mosaic_0001>

<bundles_post_ra>
// kernel: tpu_custom_call.1
= control target key start
LH: loop header
LB: loop body
LE: loop exit
PB: predicated region body
PF: predicated region fallthrough
CT: control target
= control target key end

     0   :  { %8 = vsyncpa [#allocation3], 0  ;;  %s876_s0 = inlined_call_operand.vmem [shape: bf16[3,16,16], index: 0, kind: input, shape index: {}]   ;;  %s877_s1 = inlined_call_operand.vmem [shape: bf16[64,16], index: 1, kind: input, shape index: {}]   ;;  %s878_s2 = inlined_call_operand.vmem [shape: bf16[16,64], index: 2, kind: input, shape index: {}]   ;;  %s879_s3 = inlined_call_operand.hbm [shape: bf16[3,64,64], index: 3, kind: output, shape index: {}]  }
   0x1   :  { %10 = vsyncpa [#allocation3 + $0x1], 0  ;;  %s720_s12 = smov 0   ;;  %s722_s13 = smov 0  }
   0x2   :  { %s724_s14 = smov 0   ;;  %s726_s15 = smov 0  }
   0x3   :  { %s728_s16 = smov 0   ;;  %s730_s17 = smov 0  }
   0x4   :  { %s732_s18 = smov 0   ;;  %s734_s19 = smov 0  }
   0x5 LB: > { %s475_s20 = sadd.s32 4294967295, %s695_s19   ;;  %s476_s21 = sadd.s32 4294967294, %s695_s19   ;;  %s695_s19 = sphi %s734_s19, %s16_s19   ;;  %s691_s18 = sphi %s732_s18, %s888_s18   ;;  %s687_s17 = sphi %s730_s17, %s887_s17   ;;  %s683_s16 = sphi %s728_s16, %s886_s16   ;;  %s679_s15 = sphi %s726_s15, %s885_s15   ;;  %s675_s14 = sphi %s724_s14, %s884_s14   ;;  %s671_s13 = sphi %s722_s13, %s883_s13   ;;  %s667_s12 = sphi %s720_s12, %s882_s12  }
   0x6   : > { %s25_s22 = sadd.s32 1, %s687_s17  ;;  %s28_s23 = sadd.s32 1, %s691_s18 }
   0x7   : > { %p26_p0 = scmp.ge.s32.totalorder %s25_s22, 2  ;;  %p120_p1 = scmp.ne.s32.totalorder %s675_s14, %s671_s13 }
   0x8   : > { %p121_p2 = scmp.eq.s32.totalorder %s475_s20, 5  ;;  %p126_p5 = scmp.ne.s32.totalorder %s671_s13, %s667_s12 }
   0x9   : > { %s890_s22 = smov (%p26_p0, %s25_s22), 0  ;;  %s892_s23 = smov (!%p26_p0, %s28_s23), %s691_s18 }
   0xa   : > { %s106_s24 = ssub.s32 %s687_s17, %s890_s22  ;;  %p771_p3 = por %p121_p2, %p120_p1 }
   0xb   : > { %p30_p4 = scmp.ge.s32.totalorder %s892_s23, 3  ;;  %p127_p6 = scmp.eq.s32.totalorder %s476_s21, 5 }
   0xc   : > { %p479_p7 = scmp.ge.s32.totalorder %s695_s19, 1  ;;  %p165_p9 = scmp.lt.s32.totalorder %s695_s19, 7 }
   0xd   : > { %s894_s23 = smov (%p30_p4, %s892_s23), 0  ;;  %p780_p8 = por %p127_p6, %p126_p5 }
   0xe   : > { %s105_s27 = ssub.s32 %s691_s18, %s894_s23  ;;  %s110_s28 = sadd.s32 1, %s675_s14 }
   0xf   : > { %s107_s29 = sor.u32 %s106_s24, %s105_s27  ;;  %p166_p10 = pnand %p479_p7, %p165_p9 }
  0x10   : > { %p108_p11 = scmp.eq.s32.totalorder %s107_s29, 0  ;;  %p194_p12 = scmp.lt.s32.totalorder (!%p166_p10), %s683_s16, 2 }
  0x11   : > { %169 = sbr.rel (%p166_p10) target bundleno = 448 (0x1c0), region = 32  ;;  %s793_s4 = sshll.u32 (!%p166_p10), %s679_s15, 2 }
  0x12   : > { %s789_s30 = scalar_select %p108_p11, %s675_s14, %s110_s28  }
  0x13   : > { %p200_p13 = scmp.lt.s32.totalorder (!%p166_p10), %s793_s4, 7  ;;  %s191_s28 = sand.u32 (!%p166_p10), 1, %s671_s13  }
  0x14   : > { %s499_s29 = sshll.u32 (!%p166_p10), %s683_s16, 3  ;;  %s697_s21 = smov (!%p166_p10), [#allocation2]  }
  0x16   : > { %s195_s5 = scalar_select %p194_p12, %s683_s16, 2  ;;  %vm229_vm0 = vcmask 130048   ;;  %v602_v3 = vld [vmem:[%s878_s2] sm:$0xff]   ;;  %vm366_vm1 = vcmask 519168  }
  0x17   : > { %s201_s6 = scalar_select %p200_p13, %s793_s4, 7  ;;  %520 = vmatprep.subr.bf16.mxu1 %v602_v3 }
  0x18   : > { %s503_s7 = sshll.u32 %s195_s5, 3  ;;  %521 = vmatpush3.bf16.msra.mxu1 %v602_v3  ;;  %s480_s5 = sshll.u32 %s191_s28, 4 }
  0x19   : > { %s198_s10 = scalar_lea.vmem %s876_s0, %s503_s7  ;;  %s484_s11 = sshll.u32 %s201_s6, 2 }
  0x1a   : > { %v599_v0 = vld [vmem:[%s198_s10] sm:$0xff]   ;;  %s203_s24 = scalar_lea.vmem %s877_s1, %s484_s11  ;;  %s384_s6 = sadd.s32 %s499_s29, %s793_s4 }
  0x1b   : > { %v600_v1 = vld [vmem:[%s203_s24] sm:$0xff]   ;;  %514 = vmatprep.subr.bf16.mxu0 %v599_v0  ;;  %v601_v2 = vld [vmem:[%s203_s24 + $0x8] sm:$0xff]   ;;  %s500_s7 = sshll.u32 %s384_s6, 6  ;;  %s193_s8 = scalar_lea.vmem [#allocation2], %s480_s5 }
  0x1c   : > { %515 = vmatpush3.bf16.msra.mxu0 %v599_v0  ;;  %516 = vmatprep.mubr.msk.bf16.mxu0 %vm229_vm0, %v600_v1  ;;  %s387_s9 = sshll.u32 %s193_s8, 4  ;;  %s818_s20 = scalar_lea.hbm %s879_s3, %s500_s7  ;;  %s821_s9 = int_to_ptr.vmem [resolvable:$true] %s387_s9 }
  0x1d   : > { %s825_s16 = scalar_lea.sflag [#allocation3], %s191_s28  ;;  %s603_s4 = scalar_lea.vmem %s821_s9, 256 }
  0x1e   : > { %p604_p0 = scmp.ne.s32.totalorder %s821_s9, %s603_s4  ;;  %s607_s24 = sshll.u32 %s697_s21, 4  ;;  %s608_s24 = int_to_ptr.vmem [resolvable:$false] %s607_s24 }
  0x1f   : > { %517 = vmatmul.mubr.msk.bf16.vlgmr.msra.gmra.mxu0 %vm229_vm0, %v601_v2  ;;  %s609_s15 = scalar_lea.vmem %s608_s24, 512  ;;  %p610_p4 = scmp.lt.s32.totalorder %s821_s9, %s608_s24 }
  0x20   : > { %p605_p1 = pnand %p604_p0, %p771_p3  ;;  %p611_p5 = scmp.lt.s32.totalorder %s609_s15, %s603_s4 }
  0x22   : > { %p606_p2 = pneg %p605_p1  ;;  %p612_p6 = por %p611_p5, %p610_p4 }
  0x24   : > { %p613_p7 = pnand %p612_p6, %p606_p2 }
  0xdf   : > { %v518_v4 = vpop.f32.mrf.mxu0 }
  0xe1   : > { %v270_v5 = vpop.f32.mrf.mxu0 }
  0xe3   : > { %v519_v6 = vpop.f32.mrf.mxu0 }
  0xe4   : > { %v286_v9 = vpack.c.bf16 %v519_v6, %v518_v4 }
  0xe5   : > { %v273_v7 = vpop.f32.mrf.mxu0 }
  0xe6   : > { %v285_v8 = vpack.c.bf16 %v273_v7, %v270_v5 }
  0xe8   : > { %522 = vmatprep.mubr.msk.bf16.mxu1 %vm229_vm0, %v285_v8 }
  0xe9   : > { %523 = vmatmul.mubr.msk.bf16.vlgmr.msra.gmra.mxu1 %vm229_vm0, %v286_v9 }
 0x1a9   : > { %v524_v10 = vpop.f32.mrf.mxu1 }
 0x1aa   : > { %v506_v11 = vpack.c.bf16 %v524_v10, %v524_v10 }
 0x1ab   : > { %v335_v12 = vpop.f32.mrf.mxu1 }
 0x1ac   : > { %369 = vst.msk [vmem:[%s193_s8 + $0x8] sm:$0xf] %vm366_vm1, %v506_v11  ;;  %v504_v13 = vpack.c.bf16 %v335_v12, %v335_v12 }
 0x1ad   : > { %v525_v14 = vpop.f32.mrf.mxu1 }
 0x1ae   : > { %367 = vst.msk [vmem:[%s193_s8] sm:$0xf] %vm366_vm1, %v504_v13  ;;  %v507_v15 = vpack.c.bf16 %v525_v14, %v525_v14 }
 0x1af   : > { %v338_v16 = vpop.f32.mrf.mxu1 }
 0x1b0   : > { %370 = vst.msk [vmem:[%s193_s8 + $0xc] sm:$0xf] %vm366_vm1, %v507_v15  ;;  %v505_v17 = vpack.c.bf16 %v338_v16, %v338_v16 }
 0x1b2   : > { %368 = vst.msk [vmem:[%s193_s8 + $0x4] sm:$0xf] %vm366_vm1, %v505_v17 }
 0x1b3   : > { %616 = shalt.err (!%p613_p7)
}
 0x1b4   : > { %s617_s27 = scalar_lea.hbm %s818_s20, 256  ;;  %s621_s5 = scalar_lea.hbm %s879_s3, 1536 }
 0x1b5   : > { %p618_p9 = scmp.ne.s32.totalorder %s818_s20, %s617_s27  ;;  %p622_p12 = scmp.lt.s32.totalorder %s818_s20, %s879_s3 }
 0x1b6   : > { %p623_p13 = scmp.lt.s32.totalorder %s621_s5, %s617_s27 }
 0x1b7   : > { %p619_p10 = pnand %p618_p9, %p771_p3 }
 0x1b8   : > { %p624_p0 = por %p623_p13, %p622_p12 }
 0x1b9   : > { %p620_p11 = pneg %p619_p10 }
 0x1bb   : > { %p625_p1 = pnand %p624_p0, %p620_p11 }
 0x1bd   : > { %628 = shalt.err (!%p625_p1)
}
 0x1be   : > { %s698_s8 = smov 64   ;;  %s699_s10 = smov 4  }
 0x1bf   : > { %526 = dma.vmem_to_hbm [thread:$0]  (%p771_p3), %s821_s9, 256, %s818_s20, %s825_s16, %s698_s8, %s698_s8, %s699_s10  }
 0x1c0 PF: > { %p532_p2 = scmp.ge.s32.totalorder %s695_s19, 2  ;;  %s402_s11 = sand.u32 1, %s667_s12  }
 0x1c1   : > { %s403_s4 = scalar_lea.sflag [#allocation3], %s402_s11 }
 0x1c2   : > { %p529_p4 = pnand %p532_p2, %p780_p8 }
 0x1c4   : > { %p530_p5 = pneg %p529_p4 }
 0x1c6   : > { %662 = dma.done.wait (%p530_p5), %s403_s4, 256  }
 0x1c7   : > { %664 = vsyncadd (%p530_p5), %s403_s4, 4294967040  ;;  %s16_s19 = sadd.s32 1, %s695_s19   ;;  %s882_s12 = smov %s671_s13 }
 0x1c8   : > { %p13_p6 = scmp.ge.s32.totalorder %s16_s19, 8   ;;  %s883_s13 = smov %s675_s14 }
 0x1c9   : > { %s884_s14 = smov %s789_s30  ;;  %s885_s15 = smov %s687_s17 }
 0x1ca   : > { %s886_s16 = smov %s691_s18  ;;  %s887_s17 = smov %s890_s22 }
 0x1cb   : > { %s888_s18 = smov %s894_s23  ;;  %15 = sbr.rel (!%p13_p6) target bundleno = 5 (0x5), region = 70 }
 0x1d0   :  { %408 = vsyncpa [#allocation3], 1 }
 0x1d1   :  { %410 = vsyncpa [#allocation3 + $0x1], 1 }

</bundles_post_ra>
